<compile_context>
chip_gen: v7x
topology: tpu7x:2x2x1
jax: 0.10.0
libtpu: 0.0.40
codegen_flags: <defaults>
</compile_context>

<pallas_src>
import functools

import jax
import jax.numpy as jnp
from jax import lax
from jax.experimental import pallas as pl
from jax.experimental.pallas import tpu as pltpu


_VMEM_LIMIT = 48 * 1024 * 1024          # safe on v5e/v6e (128 MiB) and v7x (64 MiB)
_VMEM_TILE_BUDGET = 20 * 1024 * 1024    # double-buffered in+out blocks stay under this


# ---------------------------------------------------------------------------
# Tile selection
# ---------------------------------------------------------------------------
def _pick_pixel_tile(hw, c_in, c_out, in_bytes, out_bytes,
                     vmem_budget=_VMEM_TILE_BUDGET, max_tile=4096):
    """Pick a pixel-tile size (lane axis) and required padding.

    Prefers (a) the whole row (lane-dense, no grid overhead), else (b) the
    largest multiple-of-128 divisor under the VMEM budget (no padding), else
    (c) a multiple-of-128 tile with minimal padding.
    """
    per_pix = 2 * (c_in * in_bytes + c_out * out_bytes)   # x2 for double-buffering
    cap = max(128, min(max_tile, vmem_budget // max(per_pix, 1)))
    if hw <= cap:
        return hw, 0
    cap128 = max(128, cap - cap % 128)
    for t in range(cap128, 0, -128):
        if hw % t == 0:
            return t, 0
    return cap128, (-hw) % cap128


# ---------------------------------------------------------------------------
# Pallas kernels
# ---------------------------------------------------------------------------
def _bn_silu(z, scale, bias):
    # Affine BN (inference) + SiLU in f32; exp rides the EUP slot, exact
    # reciprocal keeps v5e-safe f32 accuracy.
    y = z * scale + bias
    return y * pl.reciprocal(1.0 + jnp.exp(-y), approx=False)


def _fused_tap_kernel(x_ref, w_ref, scale_ref, bias_ref, o_ref, *, compute_dtype):
    # (C2*k*k, C1) @ (C1, TP) on the MXU: bf16 operands (cast in-kernel from
    # the native f32 activations), f32 accumulate, fused BN+SiLU epilogue.
    # Output tile is lane-dense (TP lanes).
    x = x_ref[...].astype(compute_dtype)
    acc = jnp.dot(w_ref[...], x, preferred_element_type=jnp.float32)
    o_ref[...] = _bn_silu(acc, scale_ref[...], bias_ref[...])


def _tap_kernel(x_ref, w_ref, o_ref, *, compute_dtype):
    # Un-fused variant for the s != k fallback path.
    x = x_ref[...].astype(compute_dtype)
    o_ref[...] = jnp.dot(w_ref[...], x, preferred_element_type=jnp.float32)


def _bn_silu_kernel(y_ref, scale_ref, bias_ref, o_ref):
    o_ref[...] = _bn_silu(y_ref[...], scale_ref[...], bias_ref[...])


# ---------------------------------------------------------------------------
# Pallas wrappers
# ---------------------------------------------------------------------------
def _pallas_tap_project(x3, wT, scale_t, bias_t, *, fuse_act, compute_dtype):
    """x3: (N, C1, HW) f32, wT: (Nc, C1) bf16 -> (N, Nc, HW) f32."""
    N, C1, HW = x3.shape
    Nc = wT.shape[0]
    TP, pad = _pick_pixel_tile(HW, C1, Nc,
                               in_bytes=x3.dtype.itemsize, out_bytes=4)
    if pad:
        x3 = jnp.pad(x3, ((0, 0), (0, 0), (0, pad)))
    HWp = HW + pad

    in_specs = [
        pl.BlockSpec((None, C1, TP), lambda n, p: (n, 0, p)),
        pl.BlockSpec((Nc, C1), lambda n, p: (0, 0)),
    ]
    if fuse_act:
        kernel = functools.partial(_fused_tap_kernel, compute_dtype=compute_dtype)
        operands = (x3, wT, scale_t, bias_t)
        in_specs += [pl.BlockSpec((Nc, 1), lambda n, p: (0, 0)),
                     pl.BlockSpec((Nc, 1), lambda n, p: (0, 0))]
        transcendentals = N * Nc * HWp
    else:
        kernel = functools.partial(_tap_kernel, compute_dtype=compute_dtype)
        operands = (x3, wT)
        transcendentals = 0

    cost = pl.CostEstimate(
        flops=2 * N * HWp * C1 * Nc,
        transcendentals=transcendentals,
        bytes_accessed=(N * C1 * HWp * x3.dtype.itemsize
                        + Nc * C1 * wT.dtype.itemsize
                        + N * Nc * HWp * 4
                        + (2 * Nc * 4 if fuse_act else 0)),
    )

    out = pl.pallas_call(
        kernel,
        out_shape=jax.ShapeDtypeStruct((N, Nc, HWp), jnp.float32),
        grid=(N, HWp // TP),
        in_specs=in_specs,
        out_specs=pl.BlockSpec((None, Nc, TP), lambda n, p: (n, 0, p)),
        compiler_params=pltpu.CompilerParams(
            dimension_semantics=("parallel", "parallel"),
            vmem_limit_bytes=_VMEM_LIMIT),
        cost_estimate=cost,
    )(*operands)
    return out[:, :, :HW] if pad else out


def _pallas_bn_silu(y, scale_c, bias_c):
    """y: (N, C2, OH, OW) f32, scale/bias: (C2, 1).  Fallback-path BN+SiLU."""
    N, C2, OH, OW = y.shape
    L = OH * OW
    y3 = y.reshape(N, C2, L)
    TL, pad = _pick_pixel_tile(L, C2, C2, in_bytes=4, out_bytes=4)
    if pad:
        y3 = jnp.pad(y3, ((0, 0), (0, 0), (0, pad)))
    Lp = L + pad
    out = pl.pallas_call(
        _bn_silu_kernel,
        out_shape=jax.ShapeDtypeStruct((N, C2, Lp), jnp.float32),
        grid=(N, Lp // TL),
        in_specs=[
            pl.BlockSpec((None, C2, TL), lambda n, p: (n, 0, p)),
            pl.BlockSpec((C2, 1), lambda n, p: (0, 0)),
            pl.BlockSpec((C2, 1), lambda n, p: (0, 0)),
        ],
        out_specs=pl.BlockSpec((None, C2, TL), lambda n, p: (n, 0, p)),
        compiler_params=pltpu.CompilerParams(
            dimension_semantics=("parallel", "parallel"),
            vmem_limit_bytes=_VMEM_LIMIT),
    )(y3, scale_c, bias_c)
    if pad:
        out = out[:, :, :L]
    return out.reshape(N, C2, OH, OW)


# ---------------------------------------------------------------------------
# Forward pass (ConvTranspose2d(bias=False) -> BatchNorm2d -> SiLU), NCHW
# ---------------------------------------------------------------------------
def conv_transpose_forward(x_nchw, weight, gamma, beta, run_mean, run_var,
                           k, s, eps=1e-5, compute_dtype=jnp.bfloat16):
    N, C1, H, W = x_nchw.shape
    C2 = weight.shape[1]
    Nc = C2 * k * k
    OH = (H - 1) * s + k
    OW = (W - 1) * s + k

    scale = (gamma / jnp.sqrt(run_var + eps)).astype(jnp.float32)   # (C2,)
    bias = (beta - run_mean * scale).astype(jnp.float32)            # (C2,)

    # NCHW -> (N, C1, H*W): a free reshape, no layout transpose, no dtype pass
    # (bf16 cast for the MXU happens inside the kernel).
    x3 = x_nchw.reshape(N, C1, H * W).astype(jnp.float32)
    # weight (C1, C2, k, k) -> (Nc, C1), bf16 MXU operand (tiny, wrapper cast).
    wT = weight.reshape(C1, Nc).T.astype(compute_dtype)

    if s == k:
        # Fast path: taps neither overlap nor leave gaps, so BN+SiLU can be
        # fused per-tap into the matmul epilogue.
        scale_t = jnp.repeat(scale, k * k).reshape(Nc, 1)
        bias_t = jnp.repeat(bias, k * k).reshape(Nc, 1)
        taps = _pallas_tap_project(x3, wT, scale_t, bias_t,
                                   fuse_act=True, compute_dtype=compute_dtype)
        # Single depth-to-space pass: (N,C2,k,k,H,W) -> (N,C2,H,k,W,k) -> NCHW.
        out = jnp.transpose(taps.reshape(N, C2, k, k, H, W),
                            (0, 1, 4, 2, 5, 3)).reshape(N, C2, OH, OW)
        return out

    # Generic fallback (s != k): un-fused taps, XLA tap placement, then BN+SiLU.
    taps = _pallas_tap_project(x3, wT, None, None,
                               fuse_act=False, compute_dtype=compute_dtype)
    parts = taps.reshape(N, C2, k, k, H, W)
    if s > k:
        canvas = jnp.zeros((N, C2, H, s, W, s), jnp.float32)
        canvas = canvas.at[:, :, :, :k, :, :k].set(
            jnp.transpose(parts, (0, 1, 4, 2, 5, 3)))
        y = canvas.reshape(N, C2, H * s, W * s)[:, :, :OH, :OW]
    else:
        # TODO(synk): s < k (overlapping taps) keeps the k*k XLA scatter-add loop.
        y = jnp.zeros((N, C2, OH, OW), jnp.float32)
        for dh in range(k):
            for dw in range(k):
                y = y.at[:, :, dh:dh + (H - 1) * s + 1:s,
                             dw:dw + (W - 1) * s + 1:s].add(parts[:, :, dh, dw])
    return _pallas_bn_silu(y, scale.reshape(C2, 1), bias.reshape(C2, 1))


# ---------------------------------------------------------------------------
# Pure-JAX reference (for validation)
# ---------------------------------------------------------------------------
def reference_forward(x_nchw, weight, gamma, beta, run_mean, run_var,
                      k, s, eps=1e-5):
    # ConvTranspose2d == conv with lhs_dilation=s, padding=k-1, flipped kernel.
    w_flip = jnp.transpose(weight, (1, 0, 2, 3))[:, :, ::-1, ::-1]  # (C2,C1,k,k)
    y = lax.conv_general_dilated(
        x_nchw, w_flip,
        window_strides=(1, 1),
        padding=[(k - 1, k - 1), (k - 1, k - 1)],
        lhs_dilation=(s, s),
        dimension_numbers=("NCHW", "OIHW", "NCHW"),
        precision=lax.Precision.HIGHEST,
    )
    scale = (gamma / jnp.sqrt(run_var + eps)).reshape(1, -1, 1, 1)
    bias = beta.reshape(1, -1, 1, 1) - run_mean.reshape(1, -1, 1, 1) * scale
    z = y * scale + bias
    return z * jax.nn.sigmoid(z)


# ---------------------------------------------------------------------------
if __name__ == "__main__":
    # Module config: ConvTranspose(c1=4, c2=8, k=2, s=2, act=True)
    N, C1, H, W = 2, 4, 16, 16
    C2, K, S = 8, 2, 2

    key = jax.random.PRNGKey(0)
    kx, kw, kg, kb, km, kv = jax.random.split(key, 6)

    x = jax.random.normal(kx, (N, C1, H, W), jnp.float32)
    weight = jax.random.normal(kw, (C1, C2, K, K), jnp.float32) * 0.1
    gamma = jax.random.normal(kg, (C2,), jnp.float32) * 0.1 + 1.0
    beta = jax.random.normal(kb, (C2,), jnp.float32) * 0.1
    run_mean = jax.random.normal(km, (C2,), jnp.float32) * 0.1
    run_var = jax.random.uniform(kv, (C2,), jnp.float32, 0.5, 1.5)

    fwd = jax.jit(functools.partial(conv_transpose_forward, k=K, s=S))
    out = jax.block_until_ready(fwd(x, weight, gamma, beta, run_mean, run_var))

    # Reference on bf16-rounded operands (the kernel feeds the MXU bf16 and
    # accumulates in f32), so the comparison isolates kernel correctness.
    xr = x.astype(jnp.bfloat16).astype(jnp.float32)
    wr = weight.astype(jnp.bfloat16).astype(jnp.float32)
    ref = reference_forward(xr, wr, gamma, beta, run_mean, run_var, K, S)

    OH, OW = (H - 1) * S + K, (W - 1) * S + K
    assert out.shape == (N, C2, OH, OW), out.shape
    max_err = float(jnp.max(jnp.abs(out - ref)))
    assert jnp.allclose(out, ref, atol=1e-3, rtol=1e-3), max_err

    print("KERNEL_OK")
</pallas_src>

<mosaic_0001>
module attributes {stable_mosaic.version = 11 : i64} {
  func.func @_fused_tap_kernel(%arg0: i32, %arg1: i32, %arg2: memref<1x4x256xf32, #tpu.memory_space<vmem>>, %arg3: memref<32x4xbf16, #tpu.memory_space<vmem>>, %arg4: memref<32x1xf32, #tpu.memory_space<vmem>>, %arg5: memref<32x1xf32, #tpu.memory_space<vmem>>, %arg6: memref<1x32x256xf32, #tpu.memory_space<vmem>>) attributes {dimension_semantics = [#tpu.dimension_semantics<parallel>, #tpu.dimension_semantics<parallel>], iteration_bounds = array<i64: 2, 1>, scalar_prefetch = 0 : i64, scratch_operands = 0 : i64, tpu.core_type = #tpu.core_type<tc>, window_params = [{transform_indices = @transform_0, window_bounds = array<i64: 1, 4, 256>}, {pipeline_mode = #tpu.pipeline_mode<synchronous>, transform_indices = @transform_1, window_bounds = array<i64: 32, 4>}, {pipeline_mode = #tpu.pipeline_mode<synchronous>, transform_indices = @transform_2, window_bounds = array<i64: 32, 1>}, {pipeline_mode = #tpu.pipeline_mode<synchronous>, transform_indices = @transform_3, window_bounds = array<i64: 32, 1>}, {transform_indices = @transform_4, window_bounds = array<i64: 1, 32, 256>}]} {
    %c0 = arith.constant 0 : index
    %c0_0 = arith.constant 0 : index
    %c0_1 = arith.constant 0 : index
    %0 = vector.load %arg2[%c0, %c0_0, %c0_1] : memref<1x4x256xf32, #tpu.memory_space<vmem>>, vector<1x4x256xf32>
    %1 = vector.shape_cast %0 : vector<1x4x256xf32> to vector<4x256xf32>
    %2 = arith.truncf %1 : vector<4x256xf32> to vector<4x256xbf16>
    %c0_2 = arith.constant 0 : index
    %c0_3 = arith.constant 0 : index
    %3 = vector.load %arg3[%c0_2, %c0_3] : memref<32x4xbf16, #tpu.memory_space<vmem>>, vector<32x4xbf16>
    %cst = arith.constant dense<0.000000e+00> : vector<32x256xf32>
    %4 = tpu.matmul %3, %2, %cst {dimension_numbers = #tpu.dot_dimension_numbers<[1], [0], [0], [1], [0, 0, 1, 1], [], []>} : vector<32x4xbf16>, vector<4x256xbf16>, vector<32x256xf32> -> vector<32x256xf32>
    %c0_4 = arith.constant 0 : index
    %c0_5 = arith.constant 0 : index
    %5 = vector.load %arg4[%c0_4, %c0_5] : memref<32x1xf32, #tpu.memory_space<vmem>>, vector<32x1xf32>
    %c0_6 = arith.constant 0 : index
    %c0_7 = arith.constant 0 : index
    %6 = vector.load %arg5[%c0_6, %c0_7] : memref<32x1xf32, #tpu.memory_space<vmem>>, vector<32x1xf32>
    %7 = vector.broadcast %5 : vector<32x1xf32> to vector<32x256xf32>
    %8 = arith.mulf %4, %7 : vector<32x256xf32>
    %9 = vector.broadcast %6 : vector<32x1xf32> to vector<32x256xf32>
    %10 = arith.addf %8, %9 : vector<32x256xf32>
    %cst_8 = arith.constant 0.000000e+00 : f32
    %11 = vector.broadcast %cst_8 : f32 to vector<32x256xf32>
    %12 = arith.subf %11, %10 : vector<32x256xf32>
    %13 = math.exp %12 : vector<32x256xf32>
    %cst_9 = arith.constant 1.000000e+00 : f32
    %14 = vector.broadcast %cst_9 : f32 to vector<32x256xf32>
    %15 = arith.addf %14, %13 : vector<32x256xf32>
    %16 = tpu.reciprocal %15 : vector<32x256xf32> -> vector<32x256xf32>
    %17 = arith.mulf %10, %16 : vector<32x256xf32>
    %c0_10 = arith.constant 0 : index
    %c0_11 = arith.constant 0 : index
    %c0_12 = arith.constant 0 : index
    %18 = vector.load %arg6[%c0_10, %c0_11, %c0_12] : memref<1x32x256xf32, #tpu.memory_space<vmem>>, vector<1x32x256xf32>
    %19 = vector.shape_cast %18 : vector<1x32x256xf32> to vector<32x256xf32>
    %20 = vector.shape_cast %17 : vector<32x256xf32> to vector<1x32x256xf32>
    tpu.vector_store %arg6[%c0_10, %c0_11, %c0_12], %20 {strides = array<i32>} : memref<1x32x256xf32, #tpu.memory_space<vmem>>, vector<1x32x256xf32>,
    return
  }
  func.func @transform_0(%arg0: i32, %arg1: i32) -> (i32, i32, i32) {
    %c0_i32 = arith.constant 0 : i32
    %c0_i32_0 = arith.constant 0 : i32
    return %arg0, %c0_i32, %arg1 : i32, i32, i32
  }
  func.func @transform_1(%arg0: i32, %arg1: i32) -> (i32, i32) {
    %c0_i32 = arith.constant 0 : i32
    %c0_i32_0 = arith.constant 0 : i32
    %c0_i32_1 = arith.constant 0 : i32
    return %c0_i32, %c0_i32_0 : i32, i32
  }
  func.func @transform_2(%arg0: i32, %arg1: i32) -> (i32, i32) {
    %c0_i32 = arith.constant 0 : i32
    %c0_i32_0 = arith.constant 0 : i32
    %c0_i32_1 = arith.constant 0 : i32
    return %c0_i32, %c0_i32_0 : i32, i32
  }
  func.func @transform_3(%arg0: i32, %arg1: i32) -> (i32, i32) {
    %c0_i32 = arith.constant 0 : i32
    %c0_i32_0 = arith.constant 0 : i32
    %c0_i32_1 = arith.constant 0 : i32
    return %c0_i32, %c0_i32_0 : i32, i32
  }
  func.func @transform_4(%arg0: i32, %arg1: i32) -> (i32, i32, i32) {
    %c0_i32 = arith.constant 0 : i32
    %c0_i32_0 = arith.constant 0 : i32
    return %arg0, %c0_i32, %arg1 : i32, i32, i32
  }
}

</mosaic_0001>

<bundles_post_ra>
// kernel: conv_transpose_forward.1
= control target key start
LH: loop header
LB: loop body
LE: loop exit
PB: predicated region body
PF: predicated region fallthrough
CT: control target
= control target key end

     0   :  { %s664_s15 = smov 0   ;;  %s666_s16 = smov 0   ;;  %s763_s0 = inlined_call_operand.vmem [shape: f32[2,4,256], index: 0, kind: input, shape index: {}]   ;;  %s764_s1 = inlined_call_operand.vmem [shape: bf16[32,4], index: 1, kind: input, shape index: {}]   ;;  %s765_s2 = inlined_call_operand.vmem [shape: f32[32,1], index: 2, kind: input, shape index: {}]   ;;  %s766_s3 = inlined_call_operand.vmem [shape: f32[32,1], index: 3, kind: input, shape index: {}]   ;;  %s767_s4 = inlined_call_operand.vmem [shape: f32[2,32,256], index: 4, kind: output, shape index: {}]  }
   0x1   :  { %s668_s17 = smov 0  }
   0x2 LB: > { %s26_s18 = sadd.s32 1, %s632_s16  ;;  %p536_p0 = scmp.ge.s32.totalorder %s636_s17, 1  ;;  %s636_s17 = sphi %s668_s17, %s14_s17   ;;  %s632_s16 = sphi %s666_s16, %s769_s16   ;;  %s628_s15 = sphi %s664_s15, %s768_s15  }
   0x3   : > { %p28_p1 = scmp.ge.s32.totalorder %s26_s18, 2  ;;  %p183_p2 = scmp.lt.s32.totalorder %s636_s17, 3 }
   0x5   : > { %s771_s18 = smov (%p28_p1, %s26_s18), 0  ;;  %p184_p3 = pnand %p536_p0, %p183_p2 }
   0x6   : > { %p218_p4 = scmp.lt.s32.totalorder (!%p184_p3), %s628_s15, 1  ;;  %v638_v0 = vmov (!%p184_p3), 0   ;;  %v327_v1 = vld [vmem:[%s765_s2 + $0x10] sm:$0xff] (!%p184_p3)  ;;  %v325_v2 = vld [vmem:[%s765_s2] sm:$0xff] (!%p184_p3)  ;;  %v328_v3 = vld [vmem:[%s765_s2 + $0x18] sm:$0xff] (!%p184_p3)  ;;  %vm265_vm0 = vcmask (!%p184_p3), 1041408  }
   0x7   : > { %187 = sbr.rel (%p184_p3) target bundleno = 280 (0x118), region = 36  ;;  %304 = vmatprep.mubr.bf16.mxu0 (!%p184_p3), %v638_v0  ;;  %314 = vmatprep.mubr.bf16.mxu1 (!%p184_p3), %v638_v0  ;;  %v326_v4 = vld [vmem:[%s765_s2 + $0x8] sm:$0xff] (!%p184_p3)  ;;  %v329_v11 = vld [vmem:[%s766_s3] sm:$0xff] (!%p184_p3)  ;;  %vm258_vm1 = vcmask (!%p184_p3), 31744   ;;  %v332_v14 = vld [vmem:[%s766_s3 + $0x18] sm:$0xff] (!%p184_p3) }
   0x8   : > { %578 = vset.pattern.permute.xlu1 (!%p184_p3), %v638_v0  ;;  %577 = vset.pattern.permute.xlu0 (!%p184_p3), %v638_v0  ;;  %v330_v10 = vld [vmem:[%s766_s3 + $0x8] sm:$0xff] (!%p184_p3)  ;;  %v580_v12 = vld [vmem:[%s764_s1] sm:$0xff] (!%p184_p3)   ;;  %v331_v15 = vld [vmem:[%s766_s3 + $0x10] sm:$0xff] (!%p184_p3) }
   0x9   : > { %345 = vperm.xlu1 (!%p184_p3), %578, %v327_v1   ;;  %335 = vperm.xlu0 (!%p184_p3), %577, %v325_v2   ;;  %v581_v13 = vld [vmem:[%s764_s1 + $0x8] sm:$0xff] (!%p184_p3)  }
   0xd   : > { %350 = vperm.xlu1 (!%p184_p3), %578, %v328_v3   ;;  %340 = vperm.xlu0 (!%p184_p3), %577, %v326_v4  }
   0xe   : > { %s773_s15 = smov (!%p218_p4, %s628_s15), 1 }
   0xf   : > { %s548_s23 = sshll.u32 %s773_s15, 3  ;;  %s549_s21 = sshll.u32 %s773_s15, 6 }
  0x10   : > { %s225_s30 = scalar_lea.vmem %s763_s0, %s548_s23  ;;  %s235_s24 = scalar_lea.vmem %s767_s4, %s549_s21 }
  0x11   : > { %v238_v5 = vld [vmem:[%s225_s30] sm:$0xff]  ;;  %368 = vperm.xlu1 %578, %v330_v10   ;;  %363 = vperm.xlu0 %577, %v329_v11  }
  0x12   : > { %v240_v6 = vcombine.high %v238_v5, %v238_v5  ;;  %v242_v7 = vpack.c.bf16 %v238_v5, %v238_v5 }
  0x14   : > { %v243_v8 = vpack.c.bf16 %v240_v6, %v240_v6  ;;  %v267_v9 = vsel %vm265_vm0, %v242_v7, 0 }
  0x15   : > { %378 = vperm.xlu1 %578, %v332_v14   ;;  %373 = vperm.xlu0 %577, %v331_v15  }
  0x16   : > { %543 = vmatprep.subr.msk.bf16.mxu0 %vm265_vm0, %v243_v8  ;;  %550 = vmatprep.subr.msk.bf16.mxu1 %vm265_vm0, %v243_v8 }
  0x17   : > { %273 = vmatpush1.bf16.msra.mxu0 %v267_v9  ;;  %551 = vmatpush1.bf16.msra.mxu1 %v267_v9 }
  0x1a   : > { %544 = vmatmul.mubr.msk.bf16.vlgmr.msra.gmra.mrb[0].mxu0 %vm258_vm1, %v580_v12  ;;  %545 = vmatmul.mubr.msk.bf16.vlgmr.msra.gmra.mrb[0].mxu1 %vm258_vm1, %v581_v13 }
  0x88   : > { %v336_v16 = vpop.permute.xlu0 %335  ;;  %v346_v17 = vpop.permute.xlu1 %345 }
  0x8c   : > { %v341_v18 = vpop.permute.xlu0 %340  ;;  %v351_v19 = vpop.permute.xlu1 %350 }
  0x90   : > { %v364_v20 = vpop.permute.xlu0 %363  ;;  %v369_v21 = vpop.permute.xlu1 %368 }
  0x94   : > { %v374_v22 = vpop.permute.xlu0 %373  ;;  %v379_v39 = vpop.permute.xlu1 %378 }
  0xed   : > { %v306_v23 = vpop.f32.mrb[0].mxu0  ;;  %v316_v24 = vpop.f32.mrb[0].mxu1 }
  0xee   : > { %v353_v25 = vmul.f32 %v336_v16, %v306_v23  ;;  %v357_v26 = vmul.f32 %v346_v17, %v316_v24  ;;  %v308_v27 = vpop.f32.mrb[1].mxu0  ;;  %v318_v28 = vpop.f32.mrb[1].mxu1 }
  0xef   : > { %v354_v29 = vmul.f32 %v336_v16, %v308_v27  ;;  %v358_v30 = vmul.f32 %v346_v17, %v318_v28  ;;  %v310_v31 = vpop.f32.mrb[2].mxu0  ;;  %v320_v32 = vpop.f32.mrb[2].mxu1 }
  0xf0   : > { %v718_v33 = vadd.f32 %v364_v20, %v353_v25  ;;  %v720_v34 = vadd.f32 %v374_v22, %v357_v26  ;;  %v355_v35 = vmul.f32 %v341_v18, %v310_v31  ;;  %v359_v36 = vmul.f32 %v351_v19, %v320_v32  ;;  %v312_v37 = vpop.f32.mrb[3].mxu0  ;;  %v322_v38 = vpop.f32.mrb[3].mxu1 }
  0xf1   : > { %v722_v40 = vadd.f32 %v364_v20, %v354_v29  ;;  %v724_v41 = vadd.f32 %v374_v22, %v358_v30  ;;  %v356_v42 = vmul.f32 %v341_v18, %v312_v37  ;;  %v360_v43 = vmul.f32 %v351_v19, %v322_v38 }
  0xf2   : > { %v389_v44 = vsub.f32 0.0, %v718_v33  ;;  %v393_v45 = vsub.f32 0.0, %v720_v34  ;;  %v728_v46 = vadd.f32 %v369_v21, %v355_v35  ;;  %v730_v47 = vadd.f32 %v379_v39, %v359_v36 }
  0xf3   : > { %v390_v48 = vsub.f32 0.0, %v722_v40  ;;  %v394_v49 = vsub.f32 0.0, %v724_v41  ;;  %v734_v50 = vadd.f32 %v369_v21, %v356_v42  ;;  %v736_v51 = vadd.f32 %v379_v39, %v360_v43 }
  0xf4   : > { %v397_v52 = vmul.f32 1.442695, %v389_v44  ;;  %v405_v53 = vmul.f32 1.442695, %v393_v45  ;;  %v391_v54 = vsub.f32 0.0, %v728_v46  ;;  %v395_v55 = vsub.f32 0.0, %v730_v47 }
  0xf5   : > { %v399_v56 = vmul.f32 1.442695, %v390_v48  ;;  %v407_v57 = vmul.f32 1.442695, %v394_v49  ;;  %v392_v58 = vsub.f32 0.0, %v734_v50  ;;  %v396_v59 = vsub.f32 0.0, %v736_v51 }
  0xf6   : > { %582 = vpow2.f32 %v397_v52  ;;  %v401_v60 = vmul.f32 1.442695, %v391_v54  ;;  %v409_v61 = vmul.f32 1.442695, %v395_v55 }
  0xf7   : > { %584 = vpow2.f32 %v405_v53  ;;  %v403_v62 = vmul.f32 1.442695, %v392_v58  ;;  %v411_v63 = vmul.f32 1.442695, %v396_v59 }
  0xf8   : > { %586 = vpow2.f32 %v399_v56 }
  0xf9   : > { %588 = vpow2.f32 %v407_v57 }
  0xfa   : > { %590 = vpow2.f32 %v401_v60 }
  0xfb   : > { %592 = vpow2.f32 %v409_v61 }
  0xfc   : > { %594 = vpow2.f32 %v403_v62 }
  0xfd   : > { %596 = vpow2.f32 %v411_v63 }
 0x100   : > { %v583_v0 = vpop.eup %582 }
 0x101   : > { %v585_v1 = vpop.eup %584  ;;  %v413_v2 = vadd.f32 1.0, %v583_v0 }
 0x102   : > { %v587_v3 = vpop.eup %586  ;;  %v417_v4 = vadd.f32 1.0, %v585_v1 }
 0x103   : > { %v589_v5 = vpop.eup %588  ;;  %598 = vrcp.f32 %v413_v2  ;;  %v414_v6 = vadd.f32 1.0, %v587_v3 }
 0x104   : > { %v591_v7 = vpop.eup %590  ;;  %600 = vrcp.f32 %v417_v4  ;;  %v418_v8 = vadd.f32 1.0, %v589_v5 }
 0x105   : > { %v593_v9 = vpop.eup %592  ;;  %602 = vrcp.f32 %v414_v6  ;;  %v415_v10 = vadd.f32 1.0, %v591_v7 }
 0x106   : > { %v595_v11 = vpop.eup %594  ;;  %604 = vrcp.f32 %v418_v8  ;;  %v419_v12 = vadd.f32 1.0, %v593_v9 }
 0x107   : > { %v597_v13 = vpop.eup %596  ;;  %606 = vrcp.f32 %v415_v10  ;;  %v416_v14 = vadd.f32 1.0, %v595_v11 }
 0x108   : > { %608 = vrcp.f32 %v419_v12  ;;  %v420_v15 = vadd.f32 1.0, %v597_v13 }
 0x109   : > { %610 = vrcp.f32 %v416_v14 }
 0x10a   : > { %612 = vrcp.f32 %v420_v15 }
 0x10d   : > { %v599_v16 = vpop.eup %598 }
 0x10e   : > { %v601_v17 = vpop.eup %600  ;;  %v429_v18 = vmul.f32 %v599_v16, %v718_v33 }
 0x10f   : > { %v603_v19 = vpop.eup %602  ;;  %v433_v20 = vmul.f32 %v601_v17, %v720_v34 }
 0x110   : > { %v605_v21 = vpop.eup %604  ;;  %437 = vst [vmem:[%s235_s24] sm:$0xff] %v429_v18  ;;  %v430_v22 = vmul.f32 %v603_v19, %v722_v40 }
 0x111   : > { %v607_v23 = vpop.eup %606  ;;  %441 = vst [vmem:[%s235_s24 + $0x20] sm:$0xff] %v433_v20  ;;  %v434_v24 = vmul.f32 %v605_v21, %v724_v41 }
 0x112   : > { %v609_v25 = vpop.eup %608  ;;  %438 = vst [vmem:[%s235_s24 + $0x8] sm:$0xff] %v430_v22  ;;  %v431_v26 = vmul.f32 %v607_v23, %v728_v46 }
 0x113   : > { %v611_v27 = vpop.eup %610  ;;  %442 = vst [vmem:[%s235_s24 + $0x28] sm:$0xff] %v434_v24  ;;  %v435_v28 = vmul.f32 %v609_v25, %v730_v47 }
 0x114   : > { %v613_v29 = vpop.eup %612  ;;  %439 = vst [vmem:[%s235_s24 + $0x10] sm:$0xff] %v431_v26  ;;  %v432_v30 = vmul.f32 %v611_v27, %v734_v50 }
 0x115   : > { %443 = vst [vmem:[%s235_s24 + $0x30] sm:$0xff] %v435_v28  ;;  %v436_v31 = vmul.f32 %v613_v29, %v736_v51 }
 0x116   : > { %440 = vst [vmem:[%s235_s24 + $0x18] sm:$0xff] %v432_v30 }
 0x117   : > { %444 = vst [vmem:[%s235_s24 + $0x38] sm:$0xff] %v436_v31 }
 0x118 PF: > { %s14_s17 = sadd.s32 1, %s636_s17   ;;  %s768_s15 = smov %s632_s16 }
 0x119   : > { %p11_p5 = scmp.ge.s32.totalorder %s14_s17, 4   ;;  %s769_s16 = smov %s771_s18 }
 0x11b   :  { %13 = sbr.rel (!%p11_p5) target bundleno = 2 (0x2), region = 66 }

</bundles_post_ra>
